<compile_context>
chip_gen: v7x
topology: tpu7x:2x2x1
jax: 0.10.0
libtpu: 0.0.40
codegen_flags: <defaults>
</compile_context>

<pallas_src>
import functools

import jax
import jax.numpy as jnp
from jax.experimental import pallas as pl
from jax.experimental.pallas import tpu as pltpu  # noqa: F401  (TPU backend)


def _round_up(n, m):
    return ((n + m - 1) // m) * m


def _pad2d(a, rows, cols):
    return jnp.pad(a, ((0, rows - a.shape[0]), (0, cols - a.shape[1])))


def _fused_gcn_kernel(*refs, num_layers, agg_first):
    """refs = (a_hat, x, pool, [w_l, b_l] * L, head_w, head_b, out)."""
    a_ref, x_ref, pool_ref = refs[0], refs[1], refs[2]
    layer_refs = refs[3:3 + 2 * num_layers]
    head_w_ref = refs[3 + 2 * num_layers]
    head_b_ref = refs[4 + 2 * num_layers]
    out_ref = refs[5 + 2 * num_layers]

    a_hat = a_ref[...]                 # loaded once, stays VMEM-resident for all layers
    h = x_ref[...]
    for l in range(num_layers):        # static unroll; intermediates never leave VMEM/vregs
        w = layer_refs[2 * l][...]
        b = layer_refs[2 * l + 1][...]
        if agg_first[l]:
            h = jnp.dot(jnp.dot(a_hat, h, preferred_element_type=jnp.float32), w,
                        preferred_element_type=jnp.float32) + b
        else:
            h = jnp.dot(a_hat, jnp.dot(h, w, preferred_element_type=jnp.float32),
                        preferred_element_type=jnp.float32) + b
        if l != num_layers - 1:
            h = jnp.maximum(h, 0.0)    # relu; none after last conv (jk=None)
        # dropout(p=0.3): identity in eval mode
    pooled = jnp.dot(pool_ref[...], h, preferred_element_type=jnp.float32)
    out = jnp.dot(pooled, head_w_ref[...],
                  preferred_element_type=jnp.float32) + head_b_ref[...]
    out_ref[...] = out.astype(out_ref.dtype)


def gcn_norm_dense(edge_index, num_nodes):
    """Dense D^{-1/2} (A + I) D^{-1/2}, matching GCNConv defaults.

    Pre-existing self-loop edges are dropped before adding I so they are not
    double-counted (mirrors add_remaining_self_loops with unit weights)."""
    src, dst = edge_index[0], edge_index[1]
    keep = (src != dst).astype(jnp.float32)
    A = jnp.zeros((num_nodes, num_nodes), jnp.float32)
    A = A.at[dst, src].add(keep)               # message src -> dst (row = target)
    A = A + jnp.eye(num_nodes, dtype=jnp.float32)
    deg = A.sum(axis=1)
    dinv = jnp.where(deg > 0, jax.lax.rsqrt(deg), 0.0)
    return dinv[:, None] * A * dinv[None, :]


def builtin_gnn_forward(params, x, edge_index, batch, num_graphs):
    N, c_in = x.shape
    num_layers = len(params["conv_w"])
    hidden = params["conv_w"][0].shape[0]
    out_ch = params["head_w"].shape[0]

    # ---- plain-JAX glue: normalized adjacency + mean-pool matrix ------------
    a_hat = gcn_norm_dense(edge_index, N)
    onehot = (batch[None, :] == jnp.arange(num_graphs)[:, None]).astype(jnp.float32)
    counts = jnp.maximum(onehot.sum(axis=1, keepdims=True), 1.0)
    pool = onehot / counts                                   # (G, N) mean-pool matrix

    # ---- pad to TPU-friendly shapes: 8 sublanes / 128 lanes ------------------
    n_pad = _round_up(N, 8)
    g_pad = _round_up(num_graphs, 8)
    c_pad = _round_up(c_in, 128)
    h_pad = _round_up(hidden, 128)
    o_pad = _round_up(out_ch, 128)

    ins = [_pad2d(a_hat, n_pad, n_pad),
           _pad2d(x.astype(jnp.float32), n_pad, c_pad),
           _pad2d(pool, g_pad, n_pad)]
    agg_first = []
    fan_in = c_in
    for l in range(num_layers):
        w = params["conv_w"][l].T                 # torch (out,in) -> (in,out)
        rows = c_pad if l == 0 else h_pad
        ins.append(_pad2d(w.astype(jnp.float32), rows, h_pad))
        ins.append(_pad2d(params["conv_b"][l].astype(jnp.float32).reshape(1, -1), 1, h_pad))
        agg_first.append(fan_in < hidden)         # aggregate first when C_in < C_out
        fan_in = hidden
    ins.append(_pad2d(params["head_w"].T.astype(jnp.float32), h_pad, o_pad))
    ins.append(_pad2d(params["head_b"].astype(jnp.float32).reshape(1, -1), 1, o_pad))

    # ---- advisory cost estimate ----------------------------------------------
    flops = 0
    feat = c_pad
    for l in range(num_layers):
        flops += 2 * n_pad * n_pad * (feat if agg_first[l] else h_pad)
        flops += 2 * n_pad * feat * h_pad
        feat = h_pad
    flops += 2 * g_pad * n_pad * h_pad + 2 * g_pad * h_pad * o_pad
    bytes_accessed = 4 * (sum(int(a.size) for a in ins) + g_pad * o_pad)

    # TODO(synk): for large N, switch to a row-tiled grid (reduction axis last,
    # VMEM accumulator, dimension_semantics=('parallel','arbitrary'), A_hat
    # tile <=1024 rows on v7x's 64 MiB VMEM) or an edge-list gather/segment-sum
    # kernel; at these shapes everything fits in VMEM, so one fused call wins.
    out_p = pl.pallas_call(
        functools.partial(_fused_gcn_kernel, num_layers=num_layers,
                          agg_first=tuple(agg_first)),
        out_shape=jax.ShapeDtypeStruct((g_pad, o_pad), jnp.float32),
        grid=(1,),
        in_specs=[pl.BlockSpec(a.shape, lambda i: (0, 0)) for a in ins],
        out_specs=pl.BlockSpec((g_pad, o_pad), lambda i: (0, 0)),
        cost_estimate=pl.CostEstimate(flops=flops, transcendentals=0,
                                      bytes_accessed=bytes_accessed),
        compiler_params=pltpu.CompilerParams(dimension_semantics=("arbitrary",)),
    )(*ins)
    return out_p[:num_graphs, :out_ch]


def builtin_gnn_reference(params, x, edge_index, batch, num_graphs):
    """Pure-JAX reference for correctness checking."""
    a_hat = gcn_norm_dense(edge_index, x.shape[0])
    h = x
    L = len(params["conv_w"])
    for l in range(L):
        h = a_hat @ (h @ params["conv_w"][l].T) + params["conv_b"][l]
        if l != L - 1:
            h = jax.nn.relu(h)
    onehot = (batch[None, :] == jnp.arange(num_graphs)[:, None]).astype(jnp.float32)
    pooled = (onehot @ h) / jnp.maximum(onehot.sum(axis=1, keepdims=True), 1.0)
    return pooled @ params["head_w"].T + params["head_b"]


if __name__ == "__main__":
    key = jax.random.PRNGKey(0)
    in_channels, hidden_channels, num_layers, out_channels = 8, 32, 2, 4
    nodes_per_graph, num_graphs = 8, 2
    N = nodes_per_graph * num_graphs

    k_x, k_w, k_hw, k_hb = jax.random.split(key, 4)

    # node features
    x = jax.random.normal(k_x, (N, in_channels), jnp.float32)

    # two undirected ring graphs
    src, dst = [], []
    for g in range(num_graphs):
        base = g * nodes_per_graph
        for i in range(nodes_per_graph):
            j = (i + 1) % nodes_per_graph
            src += [base + i, base + j]
            dst += [base + j, base + i]
    edge_index = jnp.array([src, dst], dtype=jnp.int32)        # (2, E)
    batch = jnp.repeat(jnp.arange(num_graphs, dtype=jnp.int32), nodes_per_graph)

    # deterministic synthetic parameters (torch weight layout: (out, in))
    layer_keys = jax.random.split(k_w, num_layers)
    conv_w, conv_b = [], []
    fan_in = in_channels
    for l in range(num_layers):
        conv_w.append(0.1 * jax.random.normal(layer_keys[l],
                                              (hidden_channels, fan_in), jnp.float32))
        conv_b.append(jnp.zeros((hidden_channels,), jnp.float32))  # GCNConv zero-init bias
        fan_in = hidden_channels
    params = {
        "conv_w": conv_w,
        "conv_b": conv_b,
        "head_w": 0.1 * jax.random.normal(k_hw, (out_channels, hidden_channels), jnp.float32),
        "head_b": 0.05 * jax.random.normal(k_hb, (out_channels,), jnp.float32),
    }

    out = builtin_gnn_forward(params, x, edge_index, batch, num_graphs)
    jax.block_until_ready(out)
    assert out.shape == (num_graphs, out_channels)
    assert jnp.all(jnp.isfinite(out))

    ref = builtin_gnn_reference(params, x, edge_index, batch, num_graphs)
    assert jnp.allclose(out, ref, rtol=1e-2, atol=1e-2), (out, ref)
    print("KERNEL_OK")
</pallas_src>

<mosaic_0001>
module attributes {stable_mosaic.version = 11 : i64} {
  func.func @_fused_gcn_kernel(%arg0: i32, %arg1: memref<16x16xf32, #tpu.memory_space<vmem>>, %arg2: memref<16x128xf32, #tpu.memory_space<vmem>>, %arg3: memref<8x16xf32, #tpu.memory_space<vmem>>, %arg4: memref<128x128xf32, #tpu.memory_space<vmem>>, %arg5: memref<1x128xf32, #tpu.memory_space<vmem>>, %arg6: memref<128x128xf32, #tpu.memory_space<vmem>>, %arg7: memref<1x128xf32, #tpu.memory_space<vmem>>, %arg8: memref<128x128xf32, #tpu.memory_space<vmem>>, %arg9: memref<1x128xf32, #tpu.memory_space<vmem>>, %arg10: memref<8x128xf32, #tpu.memory_space<vmem>>) attributes {dimension_semantics = [#tpu.dimension_semantics<arbitrary>], iteration_bounds = array<i64: 1>, scalar_prefetch = 0 : i64, scratch_operands = 0 : i64, tpu.core_type = #tpu.core_type<tc>, window_params = [{pipeline_mode = #tpu.pipeline_mode<synchronous>, transform_indices = @transform_0, window_bounds = array<i64: 16, 16>}, {pipeline_mode = #tpu.pipeline_mode<synchronous>, transform_indices = @transform_1, window_bounds = array<i64: 16, 128>}, {pipeline_mode = #tpu.pipeline_mode<synchronous>, transform_indices = @transform_2, window_bounds = array<i64: 8, 16>}, {pipeline_mode = #tpu.pipeline_mode<synchronous>, transform_indices = @transform_3, window_bounds = array<i64: 128, 128>}, {pipeline_mode = #tpu.pipeline_mode<synchronous>, transform_indices = @transform_4, window_bounds = array<i64: 1, 128>}, {pipeline_mode = #tpu.pipeline_mode<synchronous>, transform_indices = @transform_5, window_bounds = array<i64: 128, 128>}, {pipeline_mode = #tpu.pipeline_mode<synchronous>, transform_indices = @transform_6, window_bounds = array<i64: 1, 128>}, {pipeline_mode = #tpu.pipeline_mode<synchronous>, transform_indices = @transform_7, window_bounds = array<i64: 128, 128>}, {pipeline_mode = #tpu.pipeline_mode<synchronous>, transform_indices = @transform_8, window_bounds = array<i64: 1, 128>}, {pipeline_mode = #tpu.pipeline_mode<synchronous>, transform_indices = @transform_9, window_bounds = array<i64: 8, 128>}]} {
    %c0 = arith.constant 0 : index
    %c0_0 = arith.constant 0 : index
    %0 = vector.load %arg1[%c0, %c0_0] : memref<16x16xf32, #tpu.memory_space<vmem>>, vector<16x16xf32>
    %c0_1 = arith.constant 0 : index
    %c0_2 = arith.constant 0 : index
    %1 = vector.load %arg2[%c0_1, %c0_2] : memref<16x128xf32, #tpu.memory_space<vmem>>, vector<16x128xf32>
    %c0_3 = arith.constant 0 : index
    %c0_4 = arith.constant 0 : index
    %2 = vector.load %arg4[%c0_3, %c0_4] : memref<128x128xf32, #tpu.memory_space<vmem>>, vector<128x128xf32>
    %c0_5 = arith.constant 0 : index
    %c0_6 = arith.constant 0 : index
    %3 = vector.load %arg5[%c0_5, %c0_6] : memref<1x128xf32, #tpu.memory_space<vmem>>, vector<1x128xf32>
    %cst = arith.constant dense<0.000000e+00> : vector<16x128xf32>
    %4 = tpu.matmul %0, %1, %cst {dimension_numbers = #tpu.dot_dimension_numbers<[1], [0], [0], [1], [0, 0, 1, 1], [], []>} : vector<16x16xf32>, vector<16x128xf32>, vector<16x128xf32> -> vector<16x128xf32>
    %cst_7 = arith.constant dense<0.000000e+00> : vector<16x128xf32>
    %5 = tpu.matmul %4, %2, %cst_7 {dimension_numbers = #tpu.dot_dimension_numbers<[1], [0], [0], [1], [0, 0, 1, 1], [], []>} : vector<16x128xf32>, vector<128x128xf32>, vector<16x128xf32> -> vector<16x128xf32>
    %6 = vector.broadcast %3 : vector<1x128xf32> to vector<16x128xf32>
    %7 = arith.addf %5, %6 : vector<16x128xf32>
    %cst_8 = arith.constant 0.000000e+00 : f32
    %8 = vector.broadcast %cst_8 : f32 to vector<16x128xf32>
    %9 = arith.maximumf %7, %8 : vector<16x128xf32>
    %c0_9 = arith.constant 0 : index
    %c0_10 = arith.constant 0 : index
    %10 = vector.load %arg6[%c0_9, %c0_10] : memref<128x128xf32, #tpu.memory_space<vmem>>, vector<128x128xf32>
    %c0_11 = arith.constant 0 : index
    %c0_12 = arith.constant 0 : index
    %11 = vector.load %arg7[%c0_11, %c0_12] : memref<1x128xf32, #tpu.memory_space<vmem>>, vector<1x128xf32>
    %cst_13 = arith.constant dense<0.000000e+00> : vector<16x128xf32>
    %12 = tpu.matmul %9, %10, %cst_13 {dimension_numbers = #tpu.dot_dimension_numbers<[1], [0], [0], [1], [0, 0, 1, 1], [], []>} : vector<16x128xf32>, vector<128x128xf32>, vector<16x128xf32> -> vector<16x128xf32>
    %cst_14 = arith.constant dense<0.000000e+00> : vector<16x128xf32>
    %13 = tpu.matmul %0, %12, %cst_14 {dimension_numbers = #tpu.dot_dimension_numbers<[1], [0], [0], [1], [0, 0, 1, 1], [], []>} : vector<16x16xf32>, vector<16x128xf32>, vector<16x128xf32> -> vector<16x128xf32>
    %14 = vector.broadcast %11 : vector<1x128xf32> to vector<16x128xf32>
    %15 = arith.addf %13, %14 : vector<16x128xf32>
    %c0_15 = arith.constant 0 : index
    %c0_16 = arith.constant 0 : index
    %16 = vector.load %arg3[%c0_15, %c0_16] : memref<8x16xf32, #tpu.memory_space<vmem>>, vector<8x16xf32>
    %cst_17 = arith.constant dense<0.000000e+00> : vector<8x128xf32>
    %17 = tpu.matmul %16, %15, %cst_17 {dimension_numbers = #tpu.dot_dimension_numbers<[1], [0], [0], [1], [0, 0, 1, 1], [], []>} : vector<8x16xf32>, vector<16x128xf32>, vector<8x128xf32> -> vector<8x128xf32>
    %c0_18 = arith.constant 0 : index
    %c0_19 = arith.constant 0 : index
    %18 = vector.load %arg8[%c0_18, %c0_19] : memref<128x128xf32, #tpu.memory_space<vmem>>, vector<128x128xf32>
    %cst_20 = arith.constant dense<0.000000e+00> : vector<8x128xf32>
    %19 = tpu.matmul %17, %18, %cst_20 {dimension_numbers = #tpu.dot_dimension_numbers<[1], [0], [0], [1], [0, 0, 1, 1], [], []>} : vector<8x128xf32>, vector<128x128xf32>, vector<8x128xf32> -> vector<8x128xf32>
    %c0_21 = arith.constant 0 : index
    %c0_22 = arith.constant 0 : index
    %20 = vector.load %arg9[%c0_21, %c0_22] : memref<1x128xf32, #tpu.memory_space<vmem>>, vector<1x128xf32>
    %21 = vector.broadcast %20 : vector<1x128xf32> to vector<8x128xf32>
    %22 = arith.addf %19, %21 : vector<8x128xf32>
    %c0_23 = arith.constant 0 : index
    %c0_24 = arith.constant 0 : index
    %23 = vector.load %arg10[%c0_23, %c0_24] : memref<8x128xf32, #tpu.memory_space<vmem>>, vector<8x128xf32>
    tpu.vector_store %arg10[%c0_23, %c0_24], %22 {strides = array<i32>} : memref<8x128xf32, #tpu.memory_space<vmem>>, vector<8x128xf32>,
    return
  }
  func.func @transform_0(%arg0: i32) -> (i32, i32) {
    %c0_i32 = arith.constant 0 : i32
    %c0_i32_0 = arith.constant 0 : i32
    %c0_i32_1 = arith.constant 0 : i32
    return %c0_i32, %c0_i32_0 : i32, i32
  }
  func.func @transform_1(%arg0: i32) -> (i32, i32) {
    %c0_i32 = arith.constant 0 : i32
    %c0_i32_0 = arith.constant 0 : i32
    %c0_i32_1 = arith.constant 0 : i32
    return %c0_i32, %c0_i32_0 : i32, i32
  }
  func.func @transform_2(%arg0: i32) -> (i32, i32) {
    %c0_i32 = arith.constant 0 : i32
    %c0_i32_0 = arith.constant 0 : i32
    %c0_i32_1 = arith.constant 0 : i32
    return %c0_i32, %c0_i32_0 : i32, i32
  }
  func.func @transform_3(%arg0: i32) -> (i32, i32) {
    %c0_i32 = arith.constant 0 : i32
    %c0_i32_0 = arith.constant 0 : i32
    %c0_i32_1 = arith.constant 0 : i32
    return %c0_i32, %c0_i32_0 : i32, i32
  }
  func.func @transform_4(%arg0: i32) -> (i32, i32) {
    %c0_i32 = arith.constant 0 : i32
    %c0_i32_0 = arith.constant 0 : i32
    %c0_i32_1 = arith.constant 0 : i32
    return %c0_i32, %c0_i32_0 : i32, i32
  }
  func.func @transform_5(%arg0: i32) -> (i32, i32) {
    %c0_i32 = arith.constant 0 : i32
    %c0_i32_0 = arith.constant 0 : i32
    %c0_i32_1 = arith.constant 0 : i32
    return %c0_i32, %c0_i32_0 : i32, i32
  }
  func.func @transform_6(%arg0: i32) -> (i32, i32) {
    %c0_i32 = arith.constant 0 : i32
    %c0_i32_0 = arith.constant 0 : i32
    %c0_i32_1 = arith.constant 0 : i32
    return %c0_i32, %c0_i32_0 : i32, i32
  }
  func.func @transform_7(%arg0: i32) -> (i32, i32) {
    %c0_i32 = arith.constant 0 : i32
    %c0_i32_0 = arith.constant 0 : i32
    %c0_i32_1 = arith.constant 0 : i32
    return %c0_i32, %c0_i32_0 : i32, i32
  }
  func.func @transform_8(%arg0: i32) -> (i32, i32) {
    %c0_i32 = arith.constant 0 : i32
    %c0_i32_0 = arith.constant 0 : i32
    %c0_i32_1 = arith.constant 0 : i32
    return %c0_i32, %c0_i32_0 : i32, i32
  }
  func.func @transform_9(%arg0: i32) -> (i32, i32) {
    %c0_i32 = arith.constant 0 : i32
    %c0_i32_0 = arith.constant 0 : i32
    %c0_i32_1 = arith.constant 0 : i32
    return %c0_i32, %c0_i32_0 : i32, i32
  }
}

</mosaic_0001>

<bundles_post_ra>
// kernel: tpu_custom_call.1
= control target key start
LH: loop header
LB: loop body
LE: loop exit
PB: predicated region body
PF: predicated region fallthrough
CT: control target
= control target key end

     0   :  { %14 = vsyncpa [#allocation3], 0  ;;  %s1328_s0 = inlined_call_operand.hbm [shape: f32[16,16], index: 0, kind: input, shape index: {}]   ;;  %s1329_s1 = inlined_call_operand.hbm [shape: f32[16,128], index: 1, kind: input, shape index: {}]   ;;  %s1330_s2 = inlined_call_operand.hbm [shape: f32[8,16], index: 2, kind: input, shape index: {}]   ;;  %s1331_s3 = inlined_call_operand.hbm [shape: f32[128,128], index: 3, kind: input, shape index: {}]   ;;  %s1332_s4 = inlined_call_operand.vmem [shape: f32[1,128], index: 4, kind: input, shape index: {}]   ;;  %s1333_s5 = inlined_call_operand.hbm [shape: f32[128,128], index: 5, kind: input, shape index: {}]   ;;  %s1334_s6 = inlined_call_operand.vmem [shape: f32[1,128], index: 6, kind: input, shape index: {}]   ;;  %s1335_s7 = inlined_call_operand.hbm [shape: f32[128,128], index: 7, kind: input, shape index: {}]   ;;  %s1336_s8 = inlined_call_operand.vmem [shape: f32[1,128], index: 8, kind: input, shape index: {}]   ;;  %s1337_s9 = inlined_call_operand.hbm [shape: f32[8,128], index: 9, kind: output, shape index: {}]  }
   0x1   :  { %15 = vsyncpa [#allocation6], 0 }
   0x2   :  { %16 = vsyncpa [#allocation9], 0 }
   0x3   :  { %17 = vsyncpa [#allocation12], 0 }
   0x4   :  { %18 = vsyncpa [#allocation4], 0  ;;  %s1131_s30 = smov [#allocation5]   ;;  %s1132_s11 = smov [#allocation8]  }
   0x5   :  { %s36_s10 = sshll.u32 %s1131_s30, 4  ;;  %s58_s12 = sshll.u32 %s1132_s11, 4  ;;  %s37_s10 = int_to_ptr.vmem [resolvable:$true] %s36_s10  ;;  %s1193_s12 = int_to_ptr.vmem [resolvable:$true] %s58_s12 }
   0x6   :  { %s967_s15 = scalar_lea.hbm %s1329_s1, 256 }
   0x7   :  { %p968_p0 = scmp.ne.s32.totalorder %s1329_s1, %s967_s15  ;;  %p971_p1 = scmp.lt.u32.totalorder %s967_s15, %s1329_s1 }
   0x9   :  { %p973_p2 = pnand %p971_p1, %p968_p0 }
   0xb   :  { %976 = shalt.err (!%p973_p2)
}
   0xc   :  { %s977_s20 = scalar_lea.vmem %s37_s10, 256  ;;  %p982_p4 = scmp.lt.s32.totalorder %s37_s10, %s37_s10 }
   0xd   :  { %p978_p3 = scmp.ne.s32.totalorder %s37_s10, %s977_s20  ;;  %p983_p5 = scmp.lt.s32.totalorder %s977_s20, %s977_s20 }
   0xf   :  { %p984_p6 = por %p983_p5, %p982_p4 }
  0x11   :  { %p985_p7 = pnand %p984_p6, %p978_p3 }
  0x13   :  { %988 = shalt.err (!%p985_p7)
}
  0x14   :  { %s1133_s21 = smov 128   ;;  %s1134_s22 = smov 8  }
  0x15   :  { %42 = dma.hbm_to_vmem [thread:$0]  %s1329_s1, 256, %s37_s10, [#allocation6], %s1133_s21, %s1133_s21, %s1134_s22  }
  0x16   :  { %s989_s27 = scalar_lea.hbm %s1331_s3, 2048 }
  0x17   :  { %p990_p8 = scmp.ne.s32.totalorder %s1331_s3, %s989_s27  ;;  %p993_p9 = scmp.lt.u32.totalorder %s989_s27, %s1331_s3 }
  0x19   :  { %p995_p10 = pnand %p993_p9, %p990_p8 }
  0x1b   :  { %998 = shalt.err (!%p995_p10)
}
  0x1c   :  { %s999_s13 = scalar_lea.vmem %s1193_s12, 2048  ;;  %p1004_p12 = scmp.lt.s32.totalorder %s1193_s12, %s1193_s12 }
  0x1d   :  { %p1000_p11 = scmp.ne.s32.totalorder %s1193_s12, %s999_s13  ;;  %p1005_p13 = scmp.lt.s32.totalorder %s999_s13, %s999_s13 }
  0x1f   :  { %p1006_p0 = por %p1005_p13, %p1004_p12 }
  0x21   :  { %p1007_p1 = pnand %p1006_p0, %p1000_p11 }
  0x23   :  { %1010 = shalt.err (!%p1007_p1)
}
  0x24   :  { %64 = dma.hbm_to_vmem [thread:$0]  %s1331_s3, 2048, %s1193_s12, [#allocation9], %s1133_s21, %s1133_s21, %s1134_s22  }
  0x25   :  { %s1135_s14 = smov [#allocation2]   ;;  %s1136_s16 = smov [#allocation7]  }
  0x26   :  { %s24_s15 = sshll.u32 %s1135_s14, 4  ;;  %s49_s17 = sshll.u32 %s1136_s16, 4  ;;  %s25_s15 = int_to_ptr.vmem [resolvable:$true] %s24_s15  ;;  %s50_s17 = int_to_ptr.vmem [resolvable:$true] %s49_s17 }
  0x27   :  { %s1011_s20 = scalar_lea.hbm %s1328_s0, 256 }
  0x28   :  { %p1012_p2 = scmp.ne.s32.totalorder %s1328_s0, %s1011_s20  ;;  %p1015_p3 = scmp.lt.u32.totalorder %s1011_s20, %s1328_s0 }
  0x2a   :  { %p1017_p4 = pnand %p1015_p3, %p1012_p2 }
  0x2c   :  { %1020 = shalt.err (!%p1017_p4)
}
  0x2d   :  { %s1021_s3 = scalar_lea.vmem %s25_s15, 256  ;;  %p1026_p6 = scmp.lt.s32.totalorder %s25_s15, %s25_s15 }
  0x2e   :  { %p1022_p5 = scmp.ne.s32.totalorder %s25_s15, %s1021_s3  ;;  %p1027_p7 = scmp.lt.s32.totalorder %s1021_s3, %s1021_s3 }
  0x30   :  { %p1028_p8 = por %p1027_p7, %p1026_p6 }
  0x32   :  { %p1029_p9 = pnand %p1028_p8, %p1022_p5 }
  0x34   :  { %1032 = shalt.err (!%p1029_p9)
}
  0x35   :  { %30 = dma.hbm_to_vmem [thread:$0]  %s1328_s0, 256, %s25_s15, [#allocation3], %s1133_s21, %s1133_s21, %s1134_s22  }
  0x36   :  { %s1033_s30 = scalar_lea.hbm %s1330_s2, 128 }
  0x37   :  { %p1034_p10 = scmp.ne.s32.totalorder %s1330_s2, %s1033_s30  ;;  %p1037_p11 = scmp.lt.u32.totalorder %s1033_s30, %s1330_s2 }
  0x39   :  { %p1039_p12 = pnand %p1037_p11, %p1034_p10 }
  0x3b   :  { %1042 = shalt.err (!%p1039_p12)
}
  0x3c   :  { %s1043_s14 = scalar_lea.vmem %s50_s17, 128  ;;  %p1048_p0 = scmp.lt.s32.totalorder %s50_s17, %s50_s17 }
  0x3d   :  { %p1044_p13 = scmp.ne.s32.totalorder %s50_s17, %s1043_s14  ;;  %p1049_p1 = scmp.lt.s32.totalorder %s1043_s14, %s1043_s14 }
  0x3f   :  { %p1050_p2 = por %p1049_p1, %p1048_p0 }
  0x41   :  { %p1051_p3 = pnand %p1050_p2, %p1044_p13 }
  0x43   :  { %1054 = shalt.err (!%p1051_p3)
}
  0x44   :  { %52 = dma.hbm_to_vmem [thread:$0]  %s1330_s2, 128, %s50_s17, [#allocation6]  }
  0x45   :  { %s1137_s16 = smov [#allocation10]   ;;  %s1138_s19 = smov [#allocation11]  }
  0x46   :  { %s72_s18 = sshll.u32 %s1137_s16, 4  ;;  %s86_s20 = sshll.u32 %s1138_s19, 4  ;;  %s73_s18 = int_to_ptr.vmem [resolvable:$true] %s72_s18  ;;  %s1257_s20 = int_to_ptr.vmem [resolvable:$true] %s86_s20 }
  0x47   :  { %s1055_s25 = scalar_lea.hbm %s1333_s5, 2048 }
  0x48   :  { %p1056_p4 = scmp.ne.s32.totalorder %s1333_s5, %s1055_s25  ;;  %p1059_p5 = scmp.lt.u32.totalorder %s1055_s25, %s1333_s5 }
  0x4a   :  { %p1061_p6 = pnand %p1059_p5, %p1056_p4 }
  0x4c   :  { %1064 = shalt.err (!%p1061_p6)
}
  0x4d   :  { %s1065_s2 = scalar_lea.vmem %s73_s18, 2048  ;;  %p1070_p8 = scmp.lt.s32.totalorder %s73_s18, %s73_s18 }
  0x4e   :  { %p1066_p7 = scmp.ne.s32.totalorder %s73_s18, %s1065_s2  ;;  %p1071_p9 = scmp.lt.s32.totalorder %s1065_s2, %s1065_s2 }
  0x50   :  { %p1072_p10 = por %p1071_p9, %p1070_p8 }
  0x52   :  { %p1073_p11 = pnand %p1072_p10, %p1066_p7 }
  0x54   :  { %1076 = shalt.err (!%p1073_p11)
}
  0x55   :  { %78 = dma.hbm_to_vmem [thread:$0]  %s1333_s5, 2048, %s73_s18, [#allocation9], %s1133_s21, %s1133_s21, %s1134_s22  }
  0x56   :  { %s1077_s11 = scalar_lea.hbm %s1335_s7, 2048 }
  0x57   :  { %p1078_p12 = scmp.ne.s32.totalorder %s1335_s7, %s1077_s11  ;;  %p1081_p13 = scmp.lt.u32.totalorder %s1077_s11, %s1335_s7 }
  0x59   :  { %p1083_p0 = pnand %p1081_p13, %p1078_p12 }
  0x5b   :  { %1086 = shalt.err (!%p1083_p0)
}
  0x5c   :  { %s1087_s0 = scalar_lea.vmem %s1257_s20, 2048  ;;  %p1092_p2 = scmp.lt.s32.totalorder %s1257_s20, %s1257_s20 }
  0x5d   :  { %p1088_p1 = scmp.ne.s32.totalorder %s1257_s20, %s1087_s0  ;;  %p1093_p3 = scmp.lt.s32.totalorder %s1087_s0, %s1087_s0 }
  0x5f   :  { %p1094_p4 = por %p1093_p3, %p1092_p2 }
  0x61   :  { %p1095_p5 = pnand %p1094_p4, %p1088_p1 }
  0x63   :  { %1098 = shalt.err (!%p1095_p5)
}
  0x64   :  { %92 = dma.hbm_to_vmem [thread:$0]  %s1335_s7, 2048, %s1257_s20, [#allocation12], %s1133_s21, %s1133_s21, %s1134_s22  }
  0x65   :  { %1121 = dma.done.wait [#allocation3], 256  }
  0x66   :  { %1122 = vsyncadd [#allocation3], 4294967040 }
  0x67   :  { %1123 = dma.done.wait [#allocation6], 384  }
  0x68   :  { %1124 = vsyncadd [#allocation6], 4294966912 }
  0x69   :  { %1125 = dma.done.wait [#allocation9], 4096  }
  0x6a   :  { %1126 = vsyncadd [#allocation9], 4294963200 }
  0x6b   :  { %1127 = dma.done.wait [#allocation12], 2048  }
  0x6c   :  { %1128 = vsyncadd [#allocation12], 4294965248  ;;  %vm134_vm0 = vcmask 130048   ;;  %v115_v0 = vld [vmem:[#allocation5] sm:$0xff]  ;;  %v116_v1 = vld [vmem:[#allocation5 + $0x8] sm:$0xff]  ;;  %vm1140_vm1 = vmmov 0  }
  0x6d   :  { %v1294_v2 = vld [vmem:[#allocation2] sm:$0xff]  ;;  %v856_v3 = vpack.c.bf16 %v116_v1, %v115_v0  ;;  %v117_v4 = vld [vmem:[#allocation8] sm:$0xff]  ;;  %v118_v5 = vld [vmem:[#allocation8 + $0x8] sm:$0xff]  ;;  %v1139_v1 = vmov 0.0|0.0   ;;  %s1142_s19 = smov [#allocation13]  }
  0x6e   :  { %734 = vmatprep.mubr.msk.f32.mxu0 %vm134_vm0, %v1294_v2  ;;  %v860_v6 = vpack.c.bf16 %v118_v5, %v117_v4  ;;  %v119_v7 = vld [vmem:[#allocation8 + $0x10] sm:$0xff]  ;;  %v120_v8 = vld [vmem:[#allocation8 + $0x18] sm:$0xff]  ;;  %v121_v10 = vld [vmem:[#allocation8 + $0x20] sm:$0xff]  ;;  %s646_s20 = sshll.u32 %s1142_s19, 4  ;;  %s647_s20 = int_to_ptr.vmem [resolvable:$true] %s646_s20 }
  0x6f   :  { %857 = vmatprep.subr.bf16.mxu0 %v856_v3  ;;  %v864_v9 = vpack.c.bf16 %v120_v8, %v119_v7  ;;  %v122_v11 = vld [vmem:[#allocation8 + $0x28] sm:$0xff]  ;;  %v1298_v12 = vld [vmem:[#allocation2 + $0x8] sm:$0xff]  ;;  %v123_v14 = vld [vmem:[#allocation8 + $0x30] sm:$0xff]  ;;  %p1104_p7 = scmp.lt.s32.totalorder %s647_s20, %s647_s20 }
  0x70   :  { %859 = vmatpush3.bf16.msra.mxu0 %v856_v3  ;;  %861 = vmatprep.subr.bf16.mxu1 %v860_v6  ;;  %v868_v13 = vpack.c.bf16 %v122_v11, %v121_v10  ;;  %v124_v15 = vld [vmem:[#allocation8 + $0x38] sm:$0xff]  ;;  %v125_v17 = vld [vmem:[#allocation8 + $0x40] sm:$0xff]  ;;  %v126_v18 = vld [vmem:[#allocation8 + $0x48] sm:$0xff]  ;;  %v1141_v3 = vmov 0.0  }
  0x71   :  { %863 = vmatpush3.bf16.msra.mxu1 %v860_v6  ;;  %v872_v16 = vpack.c.bf16 %v124_v15, %v123_v14  ;;  %v876_v19 = vpack.c.bf16 %v126_v18, %v125_v17  ;;  %v127_v20 = vld [vmem:[#allocation8 + $0x50] sm:$0xff]  ;;  %v128_v21 = vld [vmem:[#allocation8 + $0x58] sm:$0xff]  ;;  %v129_v23 = vld [vmem:[#allocation8 + $0x60] sm:$0xff] }
  0x72   :  { %865 = vmatprep.subr.bf16.mxu1 %v864_v9  ;;  %v880_v22 = vpack.c.bf16 %v128_v21, %v127_v20  ;;  %v130_v24 = vld [vmem:[#allocation8 + $0x68] sm:$0xff]  ;;  %v131_v26 = vld [vmem:[#allocation8 + $0x70] sm:$0xff]  ;;  %v132_v27 = vld [vmem:[#allocation8 + $0x78] sm:$0xff] }
  0x73   :  { %735 = vmatmul.mubr.msk.f32.vlgmr.msra.gmra.mrb[0].mxu0 %vm134_vm0, %v1298_v12  ;;  %v884_v25 = vpack.c.bf16 %v130_v24, %v129_v23  ;;  %v888_v28 = vpack.c.bf16 %v132_v27, %v131_v26  ;;  %v299_v29 = vld [vmem:[#allocation10] sm:$0xff]  ;;  %v300_v30 = vld [vmem:[#allocation10 + $0x8] sm:$0xff]  ;;  %v301_v31 = vld [vmem:[#allocation10 + $0x10] sm:$0xff] }
  0x74   :  { %v892_v32 = vpack.c.bf16 %v300_v30, %v299_v29  ;;  %v302_v33 = vld [vmem:[#allocation10 + $0x18] sm:$0xff]  ;;  %v303_v35 = vld [vmem:[#allocation10 + $0x20] sm:$0xff]  ;;  %v304_v36 = vld [vmem:[#allocation10 + $0x28] sm:$0xff] }
  0x75   :  { %867 = vmatpush3.bf16.msra.mxu1 %v864_v9  ;;  %v896_v34 = vpack.c.bf16 %v302_v33, %v301_v31  ;;  %v900_v37 = vpack.c.bf16 %v304_v36, %v303_v35  ;;  %v305_v38 = vld [vmem:[#allocation10 + $0x30] sm:$0xff]  ;;  %v306_v39 = vld [vmem:[#allocation10 + $0x38] sm:$0xff]  ;;  %v307_v41 = vld [vmem:[#allocation10 + $0x40] sm:$0xff] }
  0x76   :  { %869 = vmatprep.subr.bf16.mxu1 %v868_v13  ;;  %893 = vmatprep.subr.bf16.mxu0 %v892_v32  ;;  %v904_v40 = vpack.c.bf16 %v306_v39, %v305_v38  ;;  %v308_v42 = vld [vmem:[#allocation10 + $0x48] sm:$0xff]  ;;  %v309_v44 = vld [vmem:[#allocation10 + $0x50] sm:$0xff]  ;;  %v310_v45 = vld [vmem:[#allocation10 + $0x58] sm:$0xff] }
  0x77   :  { %895 = vmatpush3.bf16.msra.mxu0 %v892_v32  ;;  %v908_v43 = vpack.c.bf16 %v308_v42, %v307_v41  ;;  %v912_v46 = vpack.c.bf16 %v310_v45, %v309_v44  ;;  %v311_v47 = vld [vmem:[#allocation10 + $0x60] sm:$0xff]  ;;  %v312_v48 = vld [vmem:[#allocation10 + $0x68] sm:$0xff]  ;;  %v313_v52 = vld [vmem:[#allocation10 + $0x70] sm:$0xff] }
  0x78   :  { %897 = vmatprep.subr.bf16.mxu0 %v896_v34  ;;  %v916_v49 = vpack.c.bf16 %v312_v48, %v311_v47  ;;  %v314_v53 = vld [vmem:[#allocation10 + $0x78] sm:$0xff]  ;;  %v546_v4 = vld [vmem:[#allocation11] sm:$0xff]  ;;  %v547_v5 = vld [vmem:[#allocation11 + $0x8] sm:$0xff] }
  0x79   :  { %871 = vmatpush3.bf16.msra.mxu1 %v868_v13  ;;  %v920_v54 = vpack.c.bf16 %v314_v53, %v313_v52  ;;  %v660_v55 = vld [vmem:[%s1332_s4] ss:$0 sm:$0xff]  ;;  %v548_v6 = vld [vmem:[#allocation11 + $0x10] sm:$0xff]  ;;  %v932_v7 = vpack.c.bf16 %v547_v5, %v546_v4  ;;  %v550_v9 = vld [vmem:[#allocation11 + $0x20] sm:$0xff] }
  0x7a   :  { %873 = vmatprep.subr.bf16.mxu1 %v872_v16  ;;  %v551_v10 = vld [vmem:[#allocation11 + $0x28] sm:$0xff]  ;;  %v553_v13 = vld [vmem:[#allocation11 + $0x38] sm:$0xff]  ;;  %v554_v15 = vld [vmem:[#allocation11 + $0x40] sm:$0xff] }
  0x7b   :  { %899 = vmatpush3.bf16.msra.mxu0 %v896_v34  ;;  %v938_v11 = vpack.c.bf16 %v551_v10, %v550_v9  ;;  %v556_v18 = vld [vmem:[#allocation11 + $0x50] sm:$0xff]  ;;  %v558_v21 = vld [vmem:[#allocation11 + $0x60] sm:$0xff]  ;;  %v661_v27 = vld [vmem:[%s1334_s6] ss:$0 sm:$0xff]  ;;  %s1099_s6 = scalar_lea.vmem %s647_s20, 128 }
  0x7c   :  { %901 = vmatprep.subr.bf16.mxu0 %v900_v37  ;;  %v560_v24 = vld [vmem:[#allocation11 + $0x70] sm:$0xff]  ;;  %v472_v33 = vld [vmem:[#allocation7] sm:$0xff]  ;;  %p1100_p6 = scmp.ne.s32.totalorder %s647_s20, %s1099_s6  ;;  %p1105_p8 = scmp.lt.s32.totalorder %s1099_s6, %s1099_s6 }
  0x7d   :  { %875 = vmatpush3.bf16.msra.mxu1 %v872_v16  ;;  %v555_v16 = vld [vmem:[#allocation11 + $0x48] sm:$0xff]  ;;  %v665_v36 = vld [vmem:[%s1336_s8] ss:$0 sm:$0xff] }
  0x7e   :  { %877 = vmatprep.subr.bf16.mxu1 %v876_v19  ;;  %v944_v17 = vpack.c.bf16 %v555_v16, %v554_v15  ;;  %p1106_p9 = por %p1105_p8, %p1104_p7 }
  0x7f   :  { %903 = vmatpush3.bf16.msra.mxu0 %v900_v37 }
  0x80   :  { %905 = vmatprep.subr.bf16.mxu0 %v904_v40  ;;  %p1107_p10 = pnand %p1106_p9, %p1100_p6 }
  0x81   :  { %879 = vmatpush3.bf16.msra.mxu1 %v876_v19  ;;  %v557_v19 = vld [vmem:[#allocation11 + $0x58] sm:$0xff] }
  0x82   :  { %881 = vmatprep.subr.bf16.mxu1 %v880_v22  ;;  %v947_v20 = vpack.c.bf16 %v557_v19, %v556_v18 }
  0x83   :  { %907 = vmatpush3.bf16.msra.mxu0 %v904_v40 }
  0x84   :  { %909 = vmatprep.subr.bf16.mxu0 %v908_v43 }
  0x85   :  { %883 = vmatpush3.bf16.msra.mxu1 %v880_v22  ;;  %v559_v22 = vld [vmem:[#allocation11 + $0x68] sm:$0xff] }
  0x86   :  { %885 = vmatprep.subr.bf16.mxu1 %v884_v25  ;;  %v950_v23 = vpack.c.bf16 %v559_v22, %v558_v21 }
  0x87   :  { %911 = vmatpush3.bf16.msra.mxu0 %v908_v43 }
  0x88   :  { %913 = vmatprep.subr.bf16.mxu0 %v912_v46 }
  0x89   :  { %887 = vmatpush3.bf16.msra.mxu1 %v884_v25  ;;  %v561_v25 = vld [vmem:[#allocation11 + $0x78] sm:$0xff] }
  0x8a   :  { %889 = vmatprep.subr.bf16.mxu1 %v888_v28  ;;  %v953_v26 = vpack.c.bf16 %v561_v25, %v560_v24 }
  0x8b   :  { %915 = vmatpush3.bf16.msra.mxu0 %v912_v46 }
  0x8c   :  { %917 = vmatprep.subr.bf16.mxu0 %v916_v49 }
  0x8d   :  { %891 = vmatpush3.bf16.msra.mxu1 %v888_v28 }
  0x8e   :  { %931 = vmatprep.subr.bf16.mxu1 %v1139_v1 }
  0x8f   :  { %919 = vmatpush3.bf16.msra.mxu0 %v916_v49 }
  0x90   :  { %921 = vmatprep.subr.bf16.mxu0 %v920_v54 }
  0x93   :  { %923 = vmatpush3.bf16.msra.mxu0 %v920_v54 }
 0x146   :  { %v736_v50 = vpop.f32.mrb[0].mxu0 }
 0x147   :  { %v207_v51 = vpop.f32.mrb[1].mxu0 }
 0x148   :  { %769 = vmatprep.mubr.f32.mxu1 %v207_v51 }
 0x149   :  { %770 = vmatmul.mubr.f32.vlgmr.msra.gmra.mrb[0].mxu1 %v736_v50 }
 0x14a   :  { %853 = vmatprep.mubr.msk.f32.mxu1 %vm1140_vm1, %v1141_v3  ;;  %933 = vmatpush3.bf16.msra.mxu1 %v932_v7 }
 0x14b   :  { %934 = vmatprep.subr.bf16.mxu1 %v1139_v1 }
 0x21c   :  { %v771_v56 = vpop.f32.mrb[0].mxu1 }
 0x21d   :  { %v294_v57 = vadd.f32 %v771_v56, %v660_v55  ;;  %v288_v58 = vpop.f32.mrb[1].mxu1 }
 0x21e   :  { %v289_v59 = vadd.f32 %v660_v55, %v288_v58 }
 0x21f   :  { %v298_v61 = vmax.f32 %v294_v57, 0.0 }
 0x220   :  { %v297_v60 = vmax.f32 %v289_v59, 0.0 }
 0x222   :  { %804 = vmatprep.mubr.f32.mxu0 %v297_v60 }
 0x223   :  { %805 = vmatmul.mubr.f32.vlgmr.msra.gmra.mrb[2].mxu0 %v298_v61 }
 0x224   :  { %811 = vmatprep.mubr.msk.f32.mxu0 %vm134_vm0, %v1294_v2  ;;  %v549_v2 = vld [vmem:[#allocation11 + $0x18] sm:$0xff] }
 0x225   :  { %v935_v8 = vpack.c.bf16 %v549_v2, %v548_v6 }
 0x227   :  { %936 = vmatpush3.bf16.msra.mxu1 %v935_v8 }
 0x228   :  { %937 = vmatprep.subr.bf16.mxu1 %v1139_v1 }
 0x22b   :  { %939 = vmatpush3.bf16.msra.mxu1 %v938_v11 }
 0x22c   :  { %940 = vmatprep.subr.bf16.mxu1 %v1139_v1 }
 0x2f6   :  { %v806_v62 = vpop.f32.mrb[2].mxu0 }
 0x2f7   :  { %v382_v63 = vpop.f32.mrb[3].mxu0 }
 0x2f8   :  { %v924_v0 = vpack.c.bf16 %v806_v62, %v382_v63 }
 0x2fa   :  { %925 = vmatprep.subr.bf16.mxu0 %v924_v0 }
 0x2fb   :  { %927 = vmatpush3.bf16.msra.mxu0 %v924_v0 }
 0x2fc   :  { %928 = vmatprep.subr.bf16.mxu0 %v1139_v1 }
 0x2fe   :  { %812 = vmatmul.mubr.msk.f32.vlgmr.msra.gmra.mrb[4].mxu0 %vm134_vm0, %v1298_v12  ;;  %v552_v12 = vld [vmem:[#allocation11 + $0x30] sm:$0xff] }
 0x2ff   :  { %818 = vmatprep.mubr.msk.f32.mxu0 %vm1140_vm1, %v1141_v3  ;;  %v941_v14 = vpack.c.bf16 %v553_v13, %v552_v12 }
 0x301   :  { %942 = vmatpush3.bf16.msra.mxu1 %v941_v14 }
 0x302   :  { %943 = vmatprep.subr.bf16.mxu1 %v1139_v1 }
 0x305   :  { %945 = vmatpush3.bf16.msra.mxu1 %v944_v17 }
 0x306   :  { %946 = vmatprep.subr.bf16.mxu1 %v1139_v1 }
 0x309   :  { %948 = vmatpush3.bf16.msra.mxu1 %v947_v20 }
 0x30a   :  { %949 = vmatprep.subr.bf16.mxu1 %v1139_v1 }
 0x30d   :  { %951 = vmatpush3.bf16.msra.mxu1 %v950_v23 }
 0x30e   :  { %952 = vmatprep.subr.bf16.mxu1 %v1139_v1 }
 0x311   :  { %954 = vmatpush3.bf16.msra.mxu1 %v953_v26 }
 0x3d1   :  { %v813_v28 = vpop.f32.mrb[4].mxu0 }
 0x3d2   :  { %v469_v29 = vadd.f32 %v813_v28, %v661_v27  ;;  %v463_v30 = vpop.f32.mrb[5].mxu0 }
 0x3d3   :  { %v464_v31 = vadd.f32 %v661_v27, %v463_v30 }
 0x3d5   :  { %v929_v32 = vpack.c.bf16 %v469_v29, %v464_v31 }
 0x3d7   :  { %930 = vmatpush3.bf16.msra.mxu0 %v929_v32 }
 0x3da   :  { %819 = vmatmul.mubr.msk.f32.vlgmr.msra.gmra.mrb[6].mxu0 %vm134_vm0, %v472_v33 }
 0x4ad   :  { %v542_v34 = vpop.f32.mrb[6].mxu0 }
 0x4ae   :  { %v820_v35 = vpop.f32.mrb[7].mxu0  ;;  %854 = vmatmul.mubr.f32.vlgmr.msra.gmra.mrb[2].mxu1 %v542_v34 }
 0x581   :  { %v635_v37 = vpop.f32.mrb[2].mxu1 }
 0x582   :  { %v636_v38 = vadd.f32 %v665_v36, %v635_v37  ;;  %v855_v39 = vpop.f32.mrb[3].mxu1 }
 0x584   :  { %639 = vst [vmem:[#allocation13] sm:$0xff] %v636_v38 }
 0x585   :  { %1110 = shalt.err (!%p1107_p10)
}
 0x586   :  { %s1111_s25 = scalar_lea.hbm %s1337_s9, 128 }
 0x587   :  { %p1112_p11 = scmp.ne.s32.totalorder %s1337_s9, %s1111_s25  ;;  %p1115_p12 = scmp.lt.u32.totalorder %s1111_s25, %s1337_s9 }
 0x589   :  { %p1117_p13 = pnand %p1115_p12, %p1112_p11 }
 0x58b   :  { %1120 = shalt.err (!%p1117_p13)
}
 0x58c   :  { %649 = dma.vmem_to_hbm [thread:$0]  %s647_s20, 128, %s1337_s9, [#allocation4]  }
 0x58d   :  { %1129 = dma.done.wait [#allocation4], 128  }
 0x58e   :  { %1130 = vsyncadd [#allocation4], 4294967168 }
 0x58f   :  { %653 = vsyncpa [#allocation3], 1 }
 0x590   :  { %654 = vsyncpa [#allocation6], 1 }
 0x591   :  { %655 = vsyncpa [#allocation9], 1 }
 0x592   :  { %656 = vsyncpa [#allocation12], 1 }
 0x593   :  { %657 = vsyncpa [#allocation4], 1 }

</bundles_post_ra>
